<compile_context>
chip_gen: v7x
topology: tpu7x:2x2x1
jax: 0.10.0
libtpu: 0.0.40
codegen_flags: <defaults>
</compile_context>

<pallas_src>
import functools
import math

import jax
import jax.numpy as jnp
from jax.experimental import pallas as pl
from jax.experimental.pallas import tpu as pltpu


def _round_up(x, m):
    return ((x + m - 1) // m) * m


def _vmem_budget_bytes():
    """Generation-aware VMEM budget: ~80% of physical capacity
    (v5e/v6e 128 MiB -> ~102 MiB, v7x 64 MiB -> ~51 MiB).  Falls back to the
    smallest generation (64 MiB) if the query is unavailable."""
    cap = 64 * 1024 * 1024
    try:
        info_cap = int(pltpu.get_tpu_info().vmem_capacity_bytes)
        if info_cap > 0:
            cap = info_cap
    except Exception:
        pass
    return int(0.80 * cap)


# --------------------------------------------------------------------------- #
# Kernels
# --------------------------------------------------------------------------- #
def _mlp_kernel(alpha_ref, x_ref, *refs, n_layers):
    """Fully fused MLP over one batch tile.

    alpha_ref : SMEM (1,) f32            -- shared PReLU slope
    x_ref     : VMEM (tm, Kp)            -- input tile (lane-padded to 128)
    refs      : w0, b0, w1, b1, ..., o_ref
                w_l : (Fin_p, Fout_p) bf16 padded transposed weight (resident)
                b_l : (1, Fout_p)     f32  padded bias row          (resident)
                o_ref : (tm, Np)      output tile
    The intermediate activation never leaves VMEM/vregs.
    """
    o_ref = refs[-1]
    wb = refs[:-1]
    a = alpha_ref[0]

    # bf16 LHS into the MXU, f32 accumulation.
    h = x_ref[...].astype(jnp.bfloat16)
    for layer in range(n_layers):
        w = wb[2 * layer][...]          # bf16
        b = wb[2 * layer + 1][...]      # f32
        acc = jnp.dot(h, w, preferred_element_type=jnp.float32) + b
        if layer < n_layers - 1:
            # PReLU with the single shared alpha (matches the one nn.PReLU()).
            acc = jnp.where(acc > 0, acc, a * acc)
            # Dropout == identity in eval mode (see TODO at top).
            h = acc.astype(jnp.bfloat16)   # keep inter-layer activation in bf16
        else:
            h = acc
    o_ref[...] = h.astype(o_ref.dtype)


def _layer_kernel(alpha_ref, x_ref, w_ref, b_ref, o_ref, *, apply_prelu):
    """Single Linear (+ optional PReLU) over one (batch tile, column tile)."""
    acc = jnp.dot(x_ref[...].astype(jnp.bfloat16), w_ref[...],
                  preferred_element_type=jnp.float32) + b_ref[...]
    if apply_prelu:
        a = alpha_ref[0]
        acc = jnp.where(acc > 0, acc, a * acc)
        # Dropout == identity in eval mode.
    o_ref[...] = acc.astype(o_ref.dtype)


# --------------------------------------------------------------------------- #
# Tiling / spec helpers
# --------------------------------------------------------------------------- #
def _choose_batch_tile(m):
    """Sublane-friendly batch tile.  Guarantees >= 2 grid steps for moderate
    batches so both v7x TensorCores get work; uses big (512) tiles for large
    batches to approach the HBM roofline on v5e/v6e."""
    if m <= 16:
        tm = _round_up(max(m, 8), 8)
        return tm, tm
    if m <= 512:
        tm = _round_up((m + 1) // 2, 16)      # 2 grid steps
        return tm, _round_up(m, tm)
    tm = 512
    return tm, _round_up(m, tm)


def _fused_call(xp, padded, alpha_arr, *, tm, Mp, Kp, Np, n_layers,
                vmem_limit, cost, out_dtype, single_buffer_weights):
    """Build and run the fully fused pallas_call."""

    def resident_spec(shape):
        # Grid-invariant block (index_map constant): single-buffer it so we
        # don't reserve 2x param VMEM for data that is DMA'd once.
        if single_buffer_weights:
            return pl.BlockSpec(shape, lambda i: (0, 0),
                                pipeline_mode=pl.Buffered(1))
        return pl.BlockSpec(shape, lambda i: (0, 0))

    in_specs = [
        pl.BlockSpec(memory_space=pltpu.MemorySpace.SMEM),   # alpha (scalar)
        pl.BlockSpec((tm, Kp), lambda i: (i, 0)),            # x tile
    ]
    args = [alpha_arr, xp]
    for (wp, bp) in padded:
        in_specs.append(resident_spec(wp.shape))
        in_specs.append(resident_spec(bp.shape))
        args.extend([wp, bp])
    out_spec = pl.BlockSpec((tm, Np), lambda i: (i, 0))

    kernel = functools.partial(_mlp_kernel, n_layers=n_layers)
    return pl.pallas_call(
        kernel,
        out_shape=jax.ShapeDtypeStruct((Mp, Np), out_dtype),
        grid_spec=pltpu.PrefetchScalarGridSpec(
            num_scalar_prefetch=0,
            grid=(Mp // tm,),
            in_specs=in_specs,
            out_specs=out_spec,
        ),
        compiler_params=pltpu.CompilerParams(
            dimension_semantics=("parallel",),
            vmem_limit_bytes=int(vmem_limit),
        ),
        cost_estimate=cost,
    )(*args)


def _run_layer_tiled(hp, wp, bp, alpha_arr, *, apply_prelu, tm, budget,
                     out_dtype):
    """Fallback: one Linear(+PReLU) as its own pallas_call, tiling the output
    columns so the resident weight block fits VMEM (used only when the fused
    path cannot keep all layer weights resident, e.g. huge hidden on v7x)."""
    Mp, Kp = hp.shape
    _, Fout = wp.shape
    x_itemsize = hp.dtype.itemsize

    def need(t):
        return (2 * Kp * t * 2            # double-buffered bf16 weight columns
                + 2 * t * 4               # bias columns
                + 2 * tm * t * 4          # out tiles
                + 2 * tm * Kp * x_itemsize
                + (4 << 20))

    tn = Fout
    while tn > 128 and need(tn) > budget:
        tn = max(128, _round_up(tn // 2, 128))
    Foutp = _round_up(Fout, tn)
    if Foutp != Fout:
        wp = jnp.zeros((Kp, Foutp), wp.dtype).at[:, :Fout].set(wp)
        bp = jnp.zeros((1, Foutp), bp.dtype).at[:, :Fout].set(bp)

    kernel = functools.partial(_layer_kernel, apply_prelu=apply_prelu)
    out = pl.pallas_call(
        kernel,
        out_shape=jax.ShapeDtypeStruct((Mp, Foutp), out_dtype),
        grid_spec=pltpu.PrefetchScalarGridSpec(
            num_scalar_prefetch=0,
            grid=(Mp // tm, Foutp // tn),
            in_specs=[
                pl.BlockSpec(memory_space=pltpu.MemorySpace.SMEM),
                pl.BlockSpec((tm, Kp), lambda i, j: (i, 0)),
                pl.BlockSpec((Kp, tn), lambda i, j: (0, j)),
                pl.BlockSpec((1, tn), lambda i, j: (0, j)),
            ],
            out_specs=pl.BlockSpec((tm, tn), lambda i, j: (i, j)),
        ),
        compiler_params=pltpu.CompilerParams(
            dimension_semantics=("parallel", "arbitrary"),
            vmem_limit_bytes=int(min(budget, need(tn))),
        ),
    )(alpha_arr, hp, wp, bp)
    return out[:, :Fout]


# --------------------------------------------------------------------------- #
# Forward pass
# --------------------------------------------------------------------------- #
def feedforward_net(x, params, prelu_alpha, n_layers):
    """Fused Pallas forward pass.  x: (M, in_feats); params: [(w_t, b), ...]
    with w_t stored as (in, out) so each layer is y = x @ w_t + b."""
    assert len(params) == n_layers
    M, K = x.shape
    N = params[-1][0].shape[1]

    Kp = _round_up(K, 128)
    Np = _round_up(N, 128)

    # bf16 padded weights (native MXU path, half DMA / VMEM), f32 biases.
    # Zero padding is exact: padded rows/cols/biases are 0 and PReLU(0) == 0.
    padded = []
    for (w_t, b) in params:
        fin, fout = w_t.shape
        finp, foutp = _round_up(fin, 128), _round_up(fout, 128)
        wp = jnp.zeros((finp, foutp), jnp.bfloat16).at[:fin, :fout].set(
            w_t.astype(jnp.bfloat16))
        bp = jnp.zeros((1, foutp), jnp.float32).at[0, :fout].set(
            b.astype(jnp.float32))
        padded.append((wp, bp))

    alpha_arr = jnp.asarray(prelu_alpha, jnp.float32).reshape((1,))

    # --- generation-aware VMEM budget & batch tile ---------------------------
    budget = _vmem_budget_bytes()
    param_bytes = sum(wp.size * 2 + bp.size * 4 for wp, bp in padded)
    max_feat = max([Kp, Np] + [wp.shape[1] for wp, _ in padded])
    x_itemsize = jnp.dtype(x.dtype).itemsize

    def fused_need(tile_m):
        return (param_bytes                          # single-buffered weights
                + 2 * tile_m * Kp * x_itemsize       # double-buffered x tiles
                + 2 * tile_m * Np * x_itemsize       # double-buffered out tiles
                + 2 * tile_m * max_feat * 4          # live activations (f32)
                + (4 << 20))                         # headroom

    tm, Mp = _choose_batch_tile(M)
    while tm > 8 and fused_need(tm) > budget:
        tm = max(8, _round_up(tm // 2, 8))
    Mp = _round_up(M, tm)

    xp = jnp.zeros((Mp, Kp), x.dtype).at[:M, :K].set(x)

    # --- fallback: weights too large to all sit resident (e.g. v7x 64 MiB) ---
    if fused_need(8) > budget:
        h = xp
        for layer_id, (wp, bp) in enumerate(padded):
            last = layer_id == n_layers - 1
            h = _run_layer_tiled(
                h, wp, bp, alpha_arr, apply_prelu=not last, tm=tm,
                budget=budget,
                out_dtype=(x.dtype if last else jnp.bfloat16))
        return h[:M, :N]

    # --- fused path -----------------------------------------------------------
    # Cost estimate from TRUE (unpadded) dims so XLA scheduling isn't skewed.
    true_flops = sum(2 * M * w_t.shape[0] * w_t.shape[1] for w_t, _ in params)
    true_bytes = (M * K * x_itemsize
                  + sum(w_t.size * 2 + b.size * 4 for w_t, b in params)
                  + M * N * x_itemsize)
    cost = pl.CostEstimate(flops=true_flops, transcendentals=0,
                           bytes_accessed=true_bytes)

    vmem_limit = min(budget, fused_need(tm))
    common = dict(tm=tm, Mp=Mp, Kp=Kp, Np=Np, n_layers=n_layers,
                  vmem_limit=vmem_limit, cost=cost, out_dtype=x.dtype)
    try:
        out_p = _fused_call(xp, padded, alpha_arr,
                            single_buffer_weights=True, **common)
    except Exception:
        # pipeline_mode=pl.Buffered(1) unsupported on this build: fall back to
        # default double-buffered weight blocks (costs 2x param VMEM).
        out_p = _fused_call(xp, padded, alpha_arr,
                            single_buffer_weights=False, **common)

    return out_p[:M, :N]


# --------------------------------------------------------------------------- #
# Parameter init (matches reset_parameters: xavier_uniform(gain=relu), zero bias)
# --------------------------------------------------------------------------- #
def init_feedforward_params(key, in_feats, hidden, out_feats, n_layers):
    gain = math.sqrt(2.0)  # nn.init.calculate_gain('relu')
    dims = []
    if n_layers == 1:
        dims.append((in_feats, out_feats))
    else:
        dims.append((in_feats, hidden))
        for _ in range(n_layers - 2):
            dims.append((hidden, hidden))
        dims.append((hidden, out_feats))

    params = []
    for (fan_in, fan_out) in dims:
        key, sub = jax.random.split(key)
        bound = gain * math.sqrt(6.0 / (fan_in + fan_out))
        # PyTorch weight is (out, in); store transposed (in, out) for x @ W_t.
        w_t = jax.random.uniform(sub, (fan_in, fan_out), jnp.float32,
                                 minval=-bound, maxval=bound)
        b = jnp.zeros((fan_out,), jnp.float32)
        params.append((w_t, b))
    prelu_alpha = jnp.float32(0.25)   # nn.PReLU() default (single shared alpha)
    return params, prelu_alpha


if __name__ == "__main__":
    # Small shapes: batch=8, in_feats=32, hidden=32, out_feats=16, n_layers=3
    batch, in_feats, hidden, out_feats, n_layers = 8, 32, 32, 16, 3

    key = jax.random.PRNGKey(0)
    key, kx = jax.random.split(key)
    x = jax.random.normal(kx, (batch, in_feats), jnp.float32)

    params, prelu_alpha = init_feedforward_params(
        key, in_feats, hidden, out_feats, n_layers)

    out = feedforward_net(x, params, prelu_alpha, n_layers)
    out = jax.block_until_ready(out)

    # Reference in plain JAX (eval mode: dropout = identity).  Mirror the
    # kernel's bf16 weight / LHS rounding so the comparison stays tight.
    ref = x.astype(jnp.bfloat16).astype(jnp.float32)
    for layer_id, (w_t, b) in enumerate(params):
        w16 = w_t.astype(jnp.bfloat16).astype(jnp.float32)
        ref = ref @ w16 + b
        if layer_id < n_layers - 1:
            ref = jnp.where(ref > 0, ref, prelu_alpha * ref)
            ref = ref.astype(jnp.bfloat16).astype(jnp.float32)

    assert out.shape == (batch, out_feats)
    max_err = float(jnp.max(jnp.abs(out - ref)))
    assert jnp.allclose(out, ref, atol=2e-2, rtol=2e-2), max_err

    print("KERNEL_OK")
</pallas_src>

<mosaic_0001>
module attributes {stable_mosaic.version = 11 : i64} {
  func.func @_mlp_kernel(%arg0: i32, %arg1: memref<1xf32, #tpu.memory_space<smem>>, %arg2: memref<8x128xf32, #tpu.memory_space<vmem>>, %arg3: memref<128x128xbf16, #tpu.memory_space<vmem>>, %arg4: memref<1x128xf32, #tpu.memory_space<vmem>>, %arg5: memref<128x128xbf16, #tpu.memory_space<vmem>>, %arg6: memref<1x128xf32, #tpu.memory_space<vmem>>, %arg7: memref<128x128xbf16, #tpu.memory_space<vmem>>, %arg8: memref<1x128xf32, #tpu.memory_space<vmem>>, %arg9: memref<8x128xf32, #tpu.memory_space<vmem>>) attributes {dimension_semantics = [#tpu.dimension_semantics<parallel>], iteration_bounds = array<i64: 1>, scalar_prefetch = 0 : i64, scratch_operands = 0 : i64, tpu.core_type = #tpu.core_type<tc>, window_params = [{transform_indices = @transform_0, window_bounds = array<i64: 1>}, {transform_indices = @transform_1, window_bounds = array<i64: 8, 128>}, {pipeline_mode = #tpu.pipeline_mode<synchronous>, transform_indices = @transform_2, window_bounds = array<i64: 128, 128>}, {pipeline_mode = #tpu.pipeline_mode<synchronous>, transform_indices = @transform_3, window_bounds = array<i64: 1, 128>}, {pipeline_mode = #tpu.pipeline_mode<synchronous>, transform_indices = @transform_4, window_bounds = array<i64: 128, 128>}, {pipeline_mode = #tpu.pipeline_mode<synchronous>, transform_indices = @transform_5, window_bounds = array<i64: 1, 128>}, {pipeline_mode = #tpu.pipeline_mode<synchronous>, transform_indices = @transform_6, window_bounds = array<i64: 128, 128>}, {pipeline_mode = #tpu.pipeline_mode<synchronous>, transform_indices = @transform_7, window_bounds = array<i64: 1, 128>}, {transform_indices = @transform_8, window_bounds = array<i64: 8, 128>}]} {
    %c0 = arith.constant 0 : index
    %0 = memref.load %arg1[%c0] : memref<1xf32, #tpu.memory_space<smem>>
    %c0_0 = arith.constant 0 : index
    %c0_1 = arith.constant 0 : index
    %1 = vector.load %arg2[%c0_0, %c0_1] : memref<8x128xf32, #tpu.memory_space<vmem>>, vector<8x128xf32>
    %2 = arith.truncf %1 : vector<8x128xf32> to vector<8x128xbf16>
    %c0_2 = arith.constant 0 : index
    %c0_3 = arith.constant 0 : index
    %3 = vector.load %arg3[%c0_2, %c0_3] : memref<128x128xbf16, #tpu.memory_space<vmem>>, vector<128x128xbf16>
    %c0_4 = arith.constant 0 : index
    %c0_5 = arith.constant 0 : index
    %4 = vector.load %arg4[%c0_4, %c0_5] : memref<1x128xf32, #tpu.memory_space<vmem>>, vector<1x128xf32>
    %cst = arith.constant dense<0.000000e+00> : vector<8x128xf32>
    %5 = tpu.matmul %2, %3, %cst {dimension_numbers = #tpu.dot_dimension_numbers<[1], [0], [0], [1], [0, 0, 1, 1], [], []>} : vector<8x128xbf16>, vector<128x128xbf16>, vector<8x128xf32> -> vector<8x128xf32>
    %6 = vector.broadcast %4 : vector<1x128xf32> to vector<8x128xf32>
    %7 = arith.addf %5, %6 : vector<8x128xf32>
    %cst_6 = arith.constant 0.000000e+00 : f32
    %8 = vector.broadcast %cst_6 : f32 to vector<8x128xf32>
    %9 = arith.cmpf ogt, %7, %8 : vector<8x128xf32>
    %10 = vector.broadcast %0 : f32 to vector<8x128xf32>
    %11 = arith.mulf %10, %7 : vector<8x128xf32>
    %12 = arith.select %9, %7, %11 : vector<8x128xi1>, vector<8x128xf32>
    %13 = arith.truncf %12 : vector<8x128xf32> to vector<8x128xbf16>
    %c0_7 = arith.constant 0 : index
    %c0_8 = arith.constant 0 : index
    %14 = vector.load %arg5[%c0_7, %c0_8] : memref<128x128xbf16, #tpu.memory_space<vmem>>, vector<128x128xbf16>
    %c0_9 = arith.constant 0 : index
    %c0_10 = arith.constant 0 : index
    %15 = vector.load %arg6[%c0_9, %c0_10] : memref<1x128xf32, #tpu.memory_space<vmem>>, vector<1x128xf32>
    %cst_11 = arith.constant dense<0.000000e+00> : vector<8x128xf32>
    %16 = tpu.matmul %13, %14, %cst_11 {dimension_numbers = #tpu.dot_dimension_numbers<[1], [0], [0], [1], [0, 0, 1, 1], [], []>} : vector<8x128xbf16>, vector<128x128xbf16>, vector<8x128xf32> -> vector<8x128xf32>
    %17 = vector.broadcast %15 : vector<1x128xf32> to vector<8x128xf32>
    %18 = arith.addf %16, %17 : vector<8x128xf32>
    %cst_12 = arith.constant 0.000000e+00 : f32
    %19 = vector.broadcast %cst_12 : f32 to vector<8x128xf32>
    %20 = arith.cmpf ogt, %18, %19 : vector<8x128xf32>
    %21 = vector.broadcast %0 : f32 to vector<8x128xf32>
    %22 = arith.mulf %21, %18 : vector<8x128xf32>
    %23 = arith.select %20, %18, %22 : vector<8x128xi1>, vector<8x128xf32>
    %24 = arith.truncf %23 : vector<8x128xf32> to vector<8x128xbf16>
    %c0_13 = arith.constant 0 : index
    %c0_14 = arith.constant 0 : index
    %25 = vector.load %arg7[%c0_13, %c0_14] : memref<128x128xbf16, #tpu.memory_space<vmem>>, vector<128x128xbf16>
    %c0_15 = arith.constant 0 : index
    %c0_16 = arith.constant 0 : index
    %26 = vector.load %arg8[%c0_15, %c0_16] : memref<1x128xf32, #tpu.memory_space<vmem>>, vector<1x128xf32>
    %cst_17 = arith.constant dense<0.000000e+00> : vector<8x128xf32>
    %27 = tpu.matmul %24, %25, %cst_17 {dimension_numbers = #tpu.dot_dimension_numbers<[1], [0], [0], [1], [0, 0, 1, 1], [], []>} : vector<8x128xbf16>, vector<128x128xbf16>, vector<8x128xf32> -> vector<8x128xf32>
    %28 = vector.broadcast %26 : vector<1x128xf32> to vector<8x128xf32>
    %29 = arith.addf %27, %28 : vector<8x128xf32>
    %c0_18 = arith.constant 0 : index
    %c0_19 = arith.constant 0 : index
    %30 = vector.load %arg9[%c0_18, %c0_19] : memref<8x128xf32, #tpu.memory_space<vmem>>, vector<8x128xf32>
    tpu.vector_store %arg9[%c0_18, %c0_19], %29 {strides = array<i32>} : memref<8x128xf32, #tpu.memory_space<vmem>>, vector<8x128xf32>,
    return
  }
  func.func @transform_0(%arg0: i32) -> i32 {
    %c0_i32 = arith.constant 0 : i32
    %c0_i32_0 = arith.constant 0 : i32
    return %c0_i32 : i32
  }
  func.func @transform_1(%arg0: i32) -> (i32, i32) {
    %c0_i32 = arith.constant 0 : i32
    %c0_i32_0 = arith.constant 0 : i32
    return %arg0, %c0_i32 : i32, i32
  }
  func.func @transform_2(%arg0: i32) -> (i32, i32) {
    %c0_i32 = arith.constant 0 : i32
    %c0_i32_0 = arith.constant 0 : i32
    %c0_i32_1 = arith.constant 0 : i32
    return %c0_i32, %c0_i32_0 : i32, i32
  }
  func.func @transform_3(%arg0: i32) -> (i32, i32) {
    %c0_i32 = arith.constant 0 : i32
    %c0_i32_0 = arith.constant 0 : i32
    %c0_i32_1 = arith.constant 0 : i32
    return %c0_i32, %c0_i32_0 : i32, i32
  }
  func.func @transform_4(%arg0: i32) -> (i32, i32) {
    %c0_i32 = arith.constant 0 : i32
    %c0_i32_0 = arith.constant 0 : i32
    %c0_i32_1 = arith.constant 0 : i32
    return %c0_i32, %c0_i32_0 : i32, i32
  }
  func.func @transform_5(%arg0: i32) -> (i32, i32) {
    %c0_i32 = arith.constant 0 : i32
    %c0_i32_0 = arith.constant 0 : i32
    %c0_i32_1 = arith.constant 0 : i32
    return %c0_i32, %c0_i32_0 : i32, i32
  }
  func.func @transform_6(%arg0: i32) -> (i32, i32) {
    %c0_i32 = arith.constant 0 : i32
    %c0_i32_0 = arith.constant 0 : i32
    %c0_i32_1 = arith.constant 0 : i32
    return %c0_i32, %c0_i32_0 : i32, i32
  }
  func.func @transform_7(%arg0: i32) -> (i32, i32) {
    %c0_i32 = arith.constant 0 : i32
    %c0_i32_0 = arith.constant 0 : i32
    %c0_i32_1 = arith.constant 0 : i32
    return %c0_i32, %c0_i32_0 : i32, i32
  }
  func.func @transform_8(%arg0: i32) -> (i32, i32) {
    %c0_i32 = arith.constant 0 : i32
    %c0_i32_0 = arith.constant 0 : i32
    return %arg0, %c0_i32 : i32, i32
  }
}

module attributes {stable_mosaic.version = 11 : i64} {
  func.func @_mlp_kernel(%arg0: i32, %arg1: memref<1xf32, #tpu.memory_space<smem>>, %arg2: memref<8x128xf32, #tpu.memory_space<vmem>>, %arg3: memref<128x128xbf16, #tpu.memory_space<vmem>>, %arg4: memref<1x128xf32, #tpu.memory_space<vmem>>, %arg5: memref<128x128xbf16, #tpu.memory_space<vmem>>, %arg6: memref<1x128xf32, #tpu.memory_space<vmem>>, %arg7: memref<128x128xbf16, #tpu.memory_space<vmem>>, %arg8: memref<1x128xf32, #tpu.memory_space<vmem>>, %arg9: memref<8x128xf32, #tpu.memory_space<vmem>>) attributes {dimension_semantics = [#tpu.dimension_semantics<parallel>], iteration_bounds = array<i64: 1>, scalar_prefetch = 0 : i64, scratch_operands = 0 : i64, tpu.core_type = #tpu.core_type<tc>, window_params = [{transform_indices = @transform_0, window_bounds = array<i64: 1>}, {transform_indices = @transform_1, window_bounds = array<i64: 8, 128>}, {pipeline_mode = #tpu.pipeline_mode<synchronous>, transform_indices = @transform_2, window_bounds = array<i64: 128, 128>}, {pipeline_mode = #tpu.pipeline_mode<synchronous>, transform_indices = @transform_3, window_bounds = array<i64: 1, 128>}, {pipeline_mode = #tpu.pipeline_mode<synchronous>, transform_indices = @transform_4, window_bounds = array<i64: 128, 128>}, {pipeline_mode = #tpu.pipeline_mode<synchronous>, transform_indices = @transform_5, window_bounds = array<i64: 1, 128>}, {pipeline_mode = #tpu.pipeline_mode<synchronous>, transform_indices = @transform_6, window_bounds = array<i64: 128, 128>}, {pipeline_mode = #tpu.pipeline_mode<synchronous>, transform_indices = @transform_7, window_bounds = array<i64: 1, 128>}, {transform_indices = @transform_8, window_bounds = array<i64: 8, 128>}]} {
    %c0 = arith.constant 0 : index
    %0 = memref.load %arg1[%c0] : memref<1xf32, #tpu.memory_space<smem>>
    %c0_0 = arith.constant 0 : index
    %c0_1 = arith.constant 0 : index
    %1 = vector.load %arg2[%c0_0, %c0_1] : memref<8x128xf32, #tpu.memory_space<vmem>>, vector<8x128xf32>
    %2 = arith.truncf %1 : vector<8x128xf32> to vector<8x128xbf16>
    %c0_2 = arith.constant 0 : index
    %c0_3 = arith.constant 0 : index
    %3 = vector.load %arg3[%c0_2, %c0_3] : memref<128x128xbf16, #tpu.memory_space<vmem>>, vector<128x128xbf16>
    %c0_4 = arith.constant 0 : index
    %c0_5 = arith.constant 0 : index
    %4 = vector.load %arg4[%c0_4, %c0_5] : memref<1x128xf32, #tpu.memory_space<vmem>>, vector<1x128xf32>
    %cst = arith.constant dense<0.000000e+00> : vector<8x128xf32>
    %5 = tpu.matmul %2, %3, %cst {dimension_numbers = #tpu.dot_dimension_numbers<[1], [0], [0], [1], [0, 0, 1, 1], [], []>} : vector<8x128xbf16>, vector<128x128xbf16>, vector<8x128xf32> -> vector<8x128xf32>
    %6 = vector.broadcast %4 : vector<1x128xf32> to vector<8x128xf32>
    %7 = arith.addf %5, %6 : vector<8x128xf32>
    %cst_6 = arith.constant 0.000000e+00 : f32
    %8 = vector.broadcast %cst_6 : f32 to vector<8x128xf32>
    %9 = arith.cmpf ogt, %7, %8 : vector<8x128xf32>
    %10 = vector.broadcast %0 : f32 to vector<8x128xf32>
    %11 = arith.mulf %10, %7 : vector<8x128xf32>
    %12 = arith.select %9, %7, %11 : vector<8x128xi1>, vector<8x128xf32>
    %13 = arith.truncf %12 : vector<8x128xf32> to vector<8x128xbf16>
    %c0_7 = arith.constant 0 : index
    %c0_8 = arith.constant 0 : index
    %14 = vector.load %arg5[%c0_7, %c0_8] : memref<128x128xbf16, #tpu.memory_space<vmem>>, vector<128x128xbf16>
    %c0_9 = arith.constant 0 : index
    %c0_10 = arith.constant 0 : index
    %15 = vector.load %arg6[%c0_9, %c0_10] : memref<1x128xf32, #tpu.memory_space<vmem>>, vector<1x128xf32>
    %cst_11 = arith.constant dense<0.000000e+00> : vector<8x128xf32>
    %16 = tpu.matmul %13, %14, %cst_11 {dimension_numbers = #tpu.dot_dimension_numbers<[1], [0], [0], [1], [0, 0, 1, 1], [], []>} : vector<8x128xbf16>, vector<128x128xbf16>, vector<8x128xf32> -> vector<8x128xf32>
    %17 = vector.broadcast %15 : vector<1x128xf32> to vector<8x128xf32>
    %18 = arith.addf %16, %17 : vector<8x128xf32>
    %cst_12 = arith.constant 0.000000e+00 : f32
    %19 = vector.broadcast %cst_12 : f32 to vector<8x128xf32>
    %20 = arith.cmpf ogt, %18, %19 : vector<8x128xf32>
    %21 = vector.broadcast %0 : f32 to vector<8x128xf32>
    %22 = arith.mulf %21, %18 : vector<8x128xf32>
    %23 = arith.select %20, %18, %22 : vector<8x128xi1>, vector<8x128xf32>
    %24 = arith.truncf %23 : vector<8x128xf32> to vector<8x128xbf16>
    %c0_13 = arith.constant 0 : index
    %c0_14 = arith.constant 0 : index
    %25 = vector.load %arg7[%c0_13, %c0_14] : memref<128x128xbf16, #tpu.memory_space<vmem>>, vector<128x128xbf16>
    %c0_15 = arith.constant 0 : index
    %c0_16 = arith.constant 0 : index
    %26 = vector.load %arg8[%c0_15, %c0_16] : memref<1x128xf32, #tpu.memory_space<vmem>>, vector<1x128xf32>
    %cst_17 = arith.constant dense<0.000000e+00> : vector<8x128xf32>
    %27 = tpu.matmul %24, %25, %cst_17 {dimension_numbers = #tpu.dot_dimension_numbers<[1], [0], [0], [1], [0, 0, 1, 1], [], []>} : vector<8x128xbf16>, vector<128x128xbf16>, vector<8x128xf32> -> vector<8x128xf32>
    %28 = vector.broadcast %26 : vector<1x128xf32> to vector<8x128xf32>
    %29 = arith.addf %27, %28 : vector<8x128xf32>
    %c0_18 = arith.constant 0 : index
    %c0_19 = arith.constant 0 : index
    %30 = vector.load %arg9[%c0_18, %c0_19] : memref<8x128xf32, #tpu.memory_space<vmem>>, vector<8x128xf32>
    tpu.vector_store %arg9[%c0_18, %c0_19], %29 {strides = array<i32>} : memref<8x128xf32, #tpu.memory_space<vmem>>, vector<8x128xf32>,
    return
  }
  func.func @transform_0(%arg0: i32) -> i32 {
    %c0_i32 = arith.constant 0 : i32
    %c0_i32_0 = arith.constant 0 : i32
    return %c0_i32 : i32
  }
  func.func @transform_1(%arg0: i32) -> (i32, i32) {
    %c0_i32 = arith.constant 0 : i32
    %c0_i32_0 = arith.constant 0 : i32
    return %arg0, %c0_i32 : i32, i32
  }
  func.func @transform_2(%arg0: i32) -> (i32, i32) {
    %c0_i32 = arith.constant 0 : i32
    %c0_i32_0 = arith.constant 0 : i32
    %c0_i32_1 = arith.constant 0 : i32
    return %c0_i32, %c0_i32_0 : i32, i32
  }
  func.func @transform_3(%arg0: i32) -> (i32, i32) {
    %c0_i32 = arith.constant 0 : i32
    %c0_i32_0 = arith.constant 0 : i32
    %c0_i32_1 = arith.constant 0 : i32
    return %c0_i32, %c0_i32_0 : i32, i32
  }
  func.func @transform_4(%arg0: i32) -> (i32, i32) {
    %c0_i32 = arith.constant 0 : i32
    %c0_i32_0 = arith.constant 0 : i32
    %c0_i32_1 = arith.constant 0 : i32
    return %c0_i32, %c0_i32_0 : i32, i32
  }
  func.func @transform_5(%arg0: i32) -> (i32, i32) {
    %c0_i32 = arith.constant 0 : i32
    %c0_i32_0 = arith.constant 0 : i32
    %c0_i32_1 = arith.constant 0 : i32
    return %c0_i32, %c0_i32_0 : i32, i32
  }
  func.func @transform_6(%arg0: i32) -> (i32, i32) {
    %c0_i32 = arith.constant 0 : i32
    %c0_i32_0 = arith.constant 0 : i32
    %c0_i32_1 = arith.constant 0 : i32
    return %c0_i32, %c0_i32_0 : i32, i32
  }
  func.func @transform_7(%arg0: i32) -> (i32, i32) {
    %c0_i32 = arith.constant 0 : i32
    %c0_i32_0 = arith.constant 0 : i32
    %c0_i32_1 = arith.constant 0 : i32
    return %c0_i32, %c0_i32_0 : i32, i32
  }
  func.func @transform_8(%arg0: i32) -> (i32, i32) {
    %c0_i32 = arith.constant 0 : i32
    %c0_i32_0 = arith.constant 0 : i32
    return %arg0, %c0_i32 : i32, i32
  }
}

</mosaic_0001>

<bundles_post_ra>
// kernel: tpu_custom_call.1
= control target key start
LH: loop header
LB: loop body
LE: loop exit
PB: predicated region body
PF: predicated region fallthrough
CT: control target
= control target key end

     0   :  { %14 = vsyncpa [#allocation4], 0  ;;  %s878_s0 = inlined_call_operand.<no memory space> [shape: f32[1], index: 0, kind: input, shape index: {}]   ;;  %s879_s1 = inlined_call_operand.hbm [shape: f32[8,128], index: 1, kind: input, shape index: {}]   ;;  %s880_s2 = inlined_call_operand.hbm [shape: bf16[128,128], index: 2, kind: input, shape index: {}]   ;;  %s881_s3 = inlined_call_operand.vmem [shape: f32[1,128], index: 3, kind: input, shape index: {}]   ;;  %s882_s4 = inlined_call_operand.hbm [shape: bf16[128,128], index: 4, kind: input, shape index: {}]   ;;  %s883_s5 = inlined_call_operand.vmem [shape: f32[1,128], index: 5, kind: input, shape index: {}]   ;;  %s884_s6 = inlined_call_operand.hbm [shape: bf16[128,128], index: 6, kind: input, shape index: {}]   ;;  %s885_s7 = inlined_call_operand.vmem [shape: f32[1,128], index: 7, kind: input, shape index: {}]   ;;  %s886_s8 = inlined_call_operand.hbm [shape: f32[8,128], index: 8, kind: output, shape index: {}]  }
   0x1   :  { %15 = vsyncpa [#allocation7], 0 }
   0x2   :  { %16 = vsyncpa [#allocation10], 0 }
   0x3   :  { %17 = vsyncpa [#allocation5], 0  ;;  %s713_s27 = smov [#allocation6]   ;;  %s595_s9 = scalar_lea.hbm %s880_s2, 1024 }
   0x4   :  { %s35_s28 = sshll.u32 %s713_s27, 4  ;;  %p596_p0 = scmp.ne.s32.totalorder %s880_s2, %s595_s9  ;;  %s36_s28 = int_to_ptr.vmem [resolvable:$true] %s35_s28 }
   0x5   :  { %p599_p1 = scmp.lt.u32.totalorder %s595_s9, %s880_s2 }
   0x7   :  { %p601_p2 = pnand %p599_p1, %p596_p0 }
   0x9   :  { %604 = shalt.err (!%p601_p2)
}
   0xa   :  { %s605_s14 = scalar_lea.vmem %s36_s28, 1024  ;;  %p610_p4 = scmp.lt.s32.totalorder %s36_s28, %s36_s28 }
   0xb   :  { %p606_p3 = scmp.ne.s32.totalorder %s36_s28, %s605_s14  ;;  %p611_p5 = scmp.lt.s32.totalorder %s605_s14, %s605_s14 }
   0xd   :  { %p612_p6 = por %p611_p5, %p610_p4 }
   0xf   :  { %p613_p7 = pnand %p612_p6, %p606_p3 }
  0x11   :  { %616 = shalt.err (!%p613_p7)
}
  0x12   :  { %s714_s15 = smov 64   ;;  %s715_s16 = smov 4  }
  0x13   :  { %41 = dma.hbm_to_vmem [thread:$0]  %s880_s2, 1024, %s36_s28, [#allocation7], %s714_s15, %s714_s15, %s715_s16  }
  0x14   :  { %s716_s19 = smov [#allocation3]   ;;  %s717_s21 = smov [#allocation8]  }
  0x15   :  { %s26_s20 = sshll.u32 %s716_s19, 4  ;;  %s49_s22 = sshll.u32 %s717_s21, 4  ;;  %s27_s20 = int_to_ptr.vmem [resolvable:$true] %s26_s20  ;;  %s50_s22 = int_to_ptr.vmem [resolvable:$true] %s49_s22 }
  0x16   :  { %s617_s25 = scalar_lea.hbm %s879_s1, 128 }
  0x17   :  { %p618_p8 = scmp.ne.s32.totalorder %s879_s1, %s617_s25  ;;  %p621_p9 = scmp.lt.u32.totalorder %s617_s25, %s879_s1 }
  0x19   :  { %p623_p10 = pnand %p621_p9, %p618_p8 }
  0x1b   :  { %626 = shalt.err (!%p623_p10)
}
  0x1c   :  { %s627_s2 = scalar_lea.vmem %s27_s20, 128  ;;  %p632_p12 = scmp.lt.s32.totalorder %s27_s20, %s27_s20 }
  0x1d   :  { %p628_p11 = scmp.ne.s32.totalorder %s27_s20, %s627_s2  ;;  %p633_p13 = scmp.lt.s32.totalorder %s627_s2, %s627_s2 }
  0x1f   :  { %p634_p0 = por %p633_p13, %p632_p12 }
  0x21   :  { %p635_p1 = pnand %p634_p0, %p628_p11 }
  0x23   :  { %638 = shalt.err (!%p635_p1)
}
  0x24   :  { %29 = dma.hbm_to_vmem [thread:$0]  %s879_s1, 128, %s27_s20, [#allocation4]  }
  0x25   :  { %s639_s12 = scalar_lea.hbm %s882_s4, 1024 }
  0x26   :  { %p640_p2 = scmp.ne.s32.totalorder %s882_s4, %s639_s12  ;;  %p643_p3 = scmp.lt.u32.totalorder %s639_s12, %s882_s4 }
  0x28   :  { %p645_p4 = pnand %p643_p3, %p640_p2 }
  0x2a   :  { %648 = shalt.err (!%p645_p4)
}
  0x2b   :  { %s649_s19 = scalar_lea.vmem %s50_s22, 1024  ;;  %p654_p6 = scmp.lt.s32.totalorder %s50_s22, %s50_s22 }
  0x2c   :  { %p650_p5 = scmp.ne.s32.totalorder %s50_s22, %s649_s19  ;;  %p655_p7 = scmp.lt.s32.totalorder %s649_s19, %s649_s19 }
  0x2e   :  { %p656_p8 = por %p655_p7, %p654_p6 }
  0x30   :  { %p657_p9 = pnand %p656_p8, %p650_p5 }
  0x32   :  { %660 = shalt.err (!%p657_p9)
}
  0x33   :  { %55 = dma.hbm_to_vmem [thread:$0]  %s882_s4, 1024, %s50_s22, [#allocation7], %s714_s15, %s714_s15, %s715_s16  }
  0x34   :  { %s718_s21 = smov [#allocation9]   ;;  %s661_s26 = scalar_lea.hbm %s884_s6, 1024 }
  0x35   :  { %s63_s23 = sshll.u32 %s718_s21, 4  ;;  %p662_p10 = scmp.ne.s32.totalorder %s884_s6, %s661_s26  ;;  %s64_s23 = int_to_ptr.vmem [resolvable:$true] %s63_s23 }
  0x36   :  { %p665_p11 = scmp.lt.u32.totalorder %s661_s26, %s884_s6 }
  0x38   :  { %p667_p12 = pnand %p665_p11, %p662_p10 }
  0x3a   :  { %670 = shalt.err (!%p667_p12)
}
  0x3b   :  { %s671_s28 = scalar_lea.vmem %s64_s23, 1024  ;;  %p676_p0 = scmp.lt.s32.totalorder %s64_s23, %s64_s23 }
  0x3c   :  { %p672_p13 = scmp.ne.s32.totalorder %s64_s23, %s671_s28  ;;  %p677_p1 = scmp.lt.s32.totalorder %s671_s28, %s671_s28 }
  0x3e   :  { %p678_p2 = por %p677_p1, %p676_p0 }
  0x40   :  { %p679_p3 = pnand %p678_p2, %p672_p13 }
  0x42   :  { %682 = shalt.err (!%p679_p3)
}
  0x43   :  { %69 = dma.hbm_to_vmem [thread:$0]  %s884_s6, 1024, %s64_s23, [#allocation10], %s714_s15, %s714_s15, %s715_s16  }
  0x44   :  { %705 = dma.done.wait [#allocation4], 128  }
  0x45   :  { %706 = vsyncadd [#allocation4], 4294967168 }
  0x46   :  { %707 = dma.done.wait [#allocation7], 2048  }
  0x47   :  { %708 = vsyncadd [#allocation7], 4294965248 }
  0x48   :  { %709 = dma.done.wait [#allocation10], 1024  }
  0x49   :  { %710 = vsyncadd [#allocation10], 4294966272  ;;  %v719_v0 = vmov 0.0   ;;  %vm720_vm0 = vmmov 0   ;;  %v571_v1 = vld [vmem:[#allocation6] sm:$0xff]   ;;  %v572_v2 = vld [vmem:[#allocation6 + $0x8] sm:$0xff]   ;;  %v200_v27 = vstv %s878_s0 }
  0x4a   :  { %502 = vmatprep.subr.bf16.mxu0 %v719_v0  ;;  %518 = vmatprep.mubr.msk.bf16.mxu0 %vm720_vm0, %v719_v0  ;;  %v573_v3 = vld [vmem:[#allocation6 + $0x10] sm:$0xff]   ;;  %v579_v4 = vld [vmem:[#allocation8] sm:$0xff]   ;;  %v574_v5 = vld [vmem:[#allocation6 + $0x18] sm:$0xff]   ;;  %s721_s12 = smov [#allocation11]  }
  0x4b   :  { %522 = vmatprep.subr.bf16.mxu1 %v719_v0  ;;  %538 = vmatprep.mubr.msk.bf16.mxu1 %vm720_vm0, %v719_v0  ;;  %v580_v6 = vld [vmem:[#allocation8 + $0x8] sm:$0xff]   ;;  %v575_v7 = vld [vmem:[#allocation6 + $0x20] sm:$0xff]   ;;  %v581_v8 = vld [vmem:[#allocation8 + $0x10] sm:$0xff]   ;;  %s437_s13 = sshll.u32 %s721_s12, 4  ;;  %s438_s13 = int_to_ptr.vmem [resolvable:$true] %s437_s13 }
  0x4c   :  { %503 = vmatpush3.bf16.msra.mxu0 %v571_v1  ;;  %523 = vmatpush3.bf16.msra.mxu1 %v579_v4  ;;  %v576_v9 = vld [vmem:[#allocation6 + $0x28] sm:$0xff]   ;;  %v582_v10 = vld [vmem:[#allocation8 + $0x18] sm:$0xff]   ;;  %v577_v11 = vld [vmem:[#allocation6 + $0x30] sm:$0xff]   ;;  %p688_p5 = scmp.lt.s32.totalorder %s438_s13, %s438_s13 }
  0x4d   :  { %504 = vmatprep.subr.bf16.mxu0 %v719_v0  ;;  %524 = vmatprep.subr.bf16.mxu1 %v719_v0  ;;  %v583_v12 = vld [vmem:[#allocation8 + $0x20] sm:$0xff]   ;;  %v578_v13 = vld [vmem:[#allocation6 + $0x38] sm:$0xff]   ;;  %v584_v15 = vld [vmem:[#allocation8 + $0x28] sm:$0xff]  }
  0x4e   :  { %v86_v14 = vld [vmem:[#allocation3] sm:$0xff]  ;;  %v585_v17 = vld [vmem:[#allocation8 + $0x30] sm:$0xff]   ;;  %v587_v19 = vld [vmem:[#allocation9] sm:$0xff]  }
  0x4f   :  { %v87_v16 = vpack.c.bf16 %v86_v14, %v86_v14  ;;  %v586_v18 = vld [vmem:[#allocation8 + $0x38] sm:$0xff]   ;;  %v588_v20 = vld [vmem:[#allocation9 + $0x8] sm:$0xff]   ;;  %v589_v21 = vld [vmem:[#allocation9 + $0x10] sm:$0xff]  }
  0x50   :  { %505 = vmatpush3.bf16.msra.mxu0 %v572_v2  ;;  %525 = vmatpush3.bf16.msra.mxu1 %v580_v6  ;;  %v590_v22 = vld [vmem:[#allocation9 + $0x18] sm:$0xff]   ;;  %v591_v23 = vld [vmem:[#allocation9 + $0x20] sm:$0xff]   ;;  %v592_v24 = vld [vmem:[#allocation9 + $0x28] sm:$0xff]  }
  0x51   :  { %506 = vmatprep.subr.bf16.mxu0 %v719_v0  ;;  %526 = vmatprep.subr.bf16.mxu1 %v719_v0  ;;  %v448_v25 = vld [vmem:[%s881_s3] ss:$0 sm:$0xff]  ;;  %v593_v35 = vld [vmem:[#allocation9 + $0x30] sm:$0xff]  }
  0x52   :  { %v594_v36 = vld [vmem:[#allocation9 + $0x38] sm:$0xff]  }
  0x53   :  { %v457_v37 = vld [vmem:[%s883_s5] ss:$0 sm:$0xff]  ;;  %s683_s5 = scalar_lea.vmem %s438_s13, 128 }
  0x54   :  { %507 = vmatpush3.bf16.msra.mxu0 %v573_v3  ;;  %527 = vmatpush3.bf16.msra.mxu1 %v581_v8  ;;  %v466_v46 = vld [vmem:[%s885_s7] ss:$0 sm:$0xff]  ;;  %p684_p4 = scmp.ne.s32.totalorder %s438_s13, %s683_s5  ;;  %p689_p6 = scmp.lt.s32.totalorder %s683_s5, %s683_s5 }
  0x55   :  { %508 = vmatprep.subr.bf16.mxu0 %v719_v0  ;;  %528 = vmatprep.subr.bf16.mxu1 %v719_v0 }
  0x56   :  { %p690_p7 = por %p689_p6, %p688_p5 }
  0x58   :  { %509 = vmatpush3.bf16.msra.mxu0 %v574_v5  ;;  %529 = vmatpush3.bf16.msra.mxu1 %v582_v10  ;;  %p691_p8 = pnand %p690_p7, %p684_p4 }
  0x59   :  { %510 = vmatprep.subr.bf16.mxu0 %v719_v0  ;;  %530 = vmatprep.subr.bf16.mxu1 %v719_v0 }
  0x5c   :  { %511 = vmatpush3.bf16.msra.mxu0 %v575_v7  ;;  %531 = vmatpush3.bf16.msra.mxu1 %v583_v12 }
  0x5d   :  { %512 = vmatprep.subr.bf16.mxu0 %v719_v0  ;;  %532 = vmatprep.subr.bf16.mxu1 %v719_v0 }
  0x60   :  { %513 = vmatpush3.bf16.msra.mxu0 %v576_v9  ;;  %533 = vmatpush3.bf16.msra.mxu1 %v584_v15 }
  0x61   :  { %514 = vmatprep.subr.bf16.mxu0 %v719_v0  ;;  %534 = vmatprep.subr.bf16.mxu1 %v719_v0 }
  0x64   :  { %515 = vmatpush3.bf16.msra.mxu0 %v577_v11  ;;  %535 = vmatpush3.bf16.msra.mxu1 %v585_v17 }
  0x65   :  { %516 = vmatprep.subr.bf16.mxu0 %v719_v0  ;;  %536 = vmatprep.subr.bf16.mxu1 %v719_v0 }
  0x68   :  { %517 = vmatpush3.bf16.msra.mxu0 %v578_v13  ;;  %537 = vmatpush3.bf16.msra.mxu1 %v586_v18 }
  0x69   :  { %542 = vmatprep.subr.bf16.mxu0 %v719_v0 }
  0x6b   :  { %519 = vmatmul.mubr.bf16.vlgmr.msra.gmra.mrb[0].mxu0 %v87_v16 }
  0x6c   :  { %558 = vmatprep.mubr.msk.bf16.mxu0 %vm720_vm0, %v719_v0  ;;  %543 = vmatpush3.bf16.msra.mxu0 %v587_v19 }
  0x6d   :  { %544 = vmatprep.subr.bf16.mxu0 %v719_v0 }
  0x70   :  { %545 = vmatpush3.bf16.msra.mxu0 %v588_v20 }
  0x71   :  { %546 = vmatprep.subr.bf16.mxu0 %v719_v0 }
  0x74   :  { %547 = vmatpush3.bf16.msra.mxu0 %v589_v21 }
  0x75   :  { %548 = vmatprep.subr.bf16.mxu0 %v719_v0 }
  0x78   :  { %549 = vmatpush3.bf16.msra.mxu0 %v590_v22 }
  0x79   :  { %550 = vmatprep.subr.bf16.mxu0 %v719_v0 }
  0x7c   :  { %551 = vmatpush3.bf16.msra.mxu0 %v591_v23 }
  0x7d   :  { %552 = vmatprep.subr.bf16.mxu0 %v719_v0 }
  0x80   :  { %553 = vmatpush3.bf16.msra.mxu0 %v592_v24 }
  0x81   :  { %554 = vmatprep.subr.bf16.mxu0 %v719_v0 }
  0x84   :  { %555 = vmatpush3.bf16.msra.mxu0 %v593_v35 }
  0x85   :  { %556 = vmatprep.subr.bf16.mxu0 %v719_v0 }
  0x88   :  { %557 = vmatpush3.bf16.msra.mxu0 %v594_v36 }
 0x13e   :  { %v193_v26 = vpop.f32.mrb[0].mxu0 }
 0x13f   :  { %v194_v28 = vadd.f32 %v448_v25, %v193_v26  ;;  %v520_v29 = vpop.f32.mrb[1].mxu0 }
 0x140   :  { %v196_v30 = vpop.f32.mrb[2].mxu0 }
 0x141   :  { %vm199_vm1 = vcmp.gt.f32.partialorder %v194_v28, 0.0  ;;  %v201_v31 = vmul.f32 %v200_v27, %v194_v28  ;;  %v521_v32 = vpop.f32.mrb[3].mxu0 }
 0x143   :  { %v202_v33 = vsel %vm199_vm1, %v194_v28, %v201_v31 }
 0x144   :  { %v203_v34 = vpack.c.bf16 %v202_v33, %v202_v33 }
 0x146   :  { %539 = vmatmul.mubr.bf16.vlgmr.msra.gmra.mrb[0].mxu1 %v203_v34 }
 0x219   :  { %v309_v38 = vpop.f32.mrb[0].mxu1 }
 0x21a   :  { %v310_v39 = vadd.f32 %v457_v37, %v309_v38  ;;  %v540_v40 = vpop.f32.mrb[1].mxu1 }
 0x21b   :  { %v312_v41 = vpop.f32.mrb[2].mxu1 }
 0x21c   :  { %vm315_vm2 = vcmp.gt.f32.partialorder %v310_v39, 0.0  ;;  %v316_v42 = vmul.f32 %v310_v39, %v200_v27  ;;  %v541_v43 = vpop.f32.mrb[3].mxu1 }
 0x21e   :  { %v317_v44 = vsel %vm315_vm2, %v310_v39, %v316_v42 }
 0x21f   :  { %v318_v45 = vpack.c.bf16 %v317_v44, %v317_v44 }
 0x221   :  { %559 = vmatmul.mubr.bf16.vlgmr.msra.gmra.mrb[4].mxu0 %v318_v45 }
 0x2f4   :  { %v424_v47 = vpop.f32.mrb[4].mxu0 }
 0x2f5   :  { %v425_v48 = vadd.f32 %v466_v46, %v424_v47  ;;  %v560_v49 = vpop.f32.mrb[5].mxu0 }
 0x2f6   :  { %v427_v50 = vpop.f32.mrb[6].mxu0 }
 0x2f7   :  { %430 = vst [vmem:[#allocation11] sm:$0xff] %v425_v48  ;;  %v561_v51 = vpop.f32.mrb[7].mxu0 }
 0x2f8   :  { %694 = shalt.err (!%p691_p8)
}
 0x2f9   :  { %s695_s7 = scalar_lea.hbm %s886_s8, 128 }
 0x2fa   :  { %p696_p9 = scmp.ne.s32.totalorder %s886_s8, %s695_s7  ;;  %p699_p10 = scmp.lt.u32.totalorder %s695_s7, %s886_s8 }
 0x2fc   :  { %p701_p11 = pnand %p699_p10, %p696_p9 }
 0x2fe   :  { %704 = shalt.err (!%p701_p11)
}
 0x2ff   :  { %440 = dma.vmem_to_hbm [thread:$0]  %s438_s13, 128, %s886_s8, [#allocation5]  }
 0x300   :  { %711 = dma.done.wait [#allocation5], 128  }
 0x301   :  { %712 = vsyncadd [#allocation5], 4294967168 }
 0x302   :  { %444 = vsyncpa [#allocation4], 1 }
 0x303   :  { %445 = vsyncpa [#allocation7], 1 }
 0x304   :  { %446 = vsyncpa [#allocation10], 1 }
 0x305   :  { %447 = vsyncpa [#allocation5], 1 }

// kernel: tpu_custom_call.1
= control target key start
LH: loop header
LB: loop body
LE: loop exit
PB: predicated region body
PF: predicated region fallthrough
CT: control target
= control target key end

     0   :  { %14 = vsyncpa [#allocation4], 0  ;;  %s878_s0 = inlined_call_operand.<no memory space> [shape: f32[1], index: 0, kind: input, shape index: {}]   ;;  %s879_s1 = inlined_call_operand.hbm [shape: f32[8,128], index: 1, kind: input, shape index: {}]   ;;  %s880_s2 = inlined_call_operand.hbm [shape: bf16[128,128], index: 2, kind: input, shape index: {}]   ;;  %s881_s3 = inlined_call_operand.vmem [shape: f32[1,128], index: 3, kind: input, shape index: {}]   ;;  %s882_s4 = inlined_call_operand.hbm [shape: bf16[128,128], index: 4, kind: input, shape index: {}]   ;;  %s883_s5 = inlined_call_operand.vmem [shape: f32[1,128], index: 5, kind: input, shape index: {}]   ;;  %s884_s6 = inlined_call_operand.hbm [shape: bf16[128,128], index: 6, kind: input, shape index: {}]   ;;  %s885_s7 = inlined_call_operand.vmem [shape: f32[1,128], index: 7, kind: input, shape index: {}]   ;;  %s886_s8 = inlined_call_operand.hbm [shape: f32[8,128], index: 8, kind: output, shape index: {}]  }
   0x1   :  { %15 = vsyncpa [#allocation7], 0 }
   0x2   :  { %16 = vsyncpa [#allocation10], 0 }
   0x3   :  { %17 = vsyncpa [#allocation5], 0  ;;  %s713_s27 = smov [#allocation6]   ;;  %s595_s9 = scalar_lea.hbm %s880_s2, 1024 }
   0x4   :  { %s35_s28 = sshll.u32 %s713_s27, 4  ;;  %p596_p0 = scmp.ne.s32.totalorder %s880_s2, %s595_s9  ;;  %s36_s28 = int_to_ptr.vmem [resolvable:$true] %s35_s28 }
   0x5   :  { %p599_p1 = scmp.lt.u32.totalorder %s595_s9, %s880_s2 }
   0x7   :  { %p601_p2 = pnand %p599_p1, %p596_p0 }
   0x9   :  { %604 = shalt.err (!%p601_p2)
}
   0xa   :  { %s605_s14 = scalar_lea.vmem %s36_s28, 1024  ;;  %p610_p4 = scmp.lt.s32.totalorder %s36_s28, %s36_s28 }
   0xb   :  { %p606_p3 = scmp.ne.s32.totalorder %s36_s28, %s605_s14  ;;  %p611_p5 = scmp.lt.s32.totalorder %s605_s14, %s605_s14 }
   0xd   :  { %p612_p6 = por %p611_p5, %p610_p4 }
   0xf   :  { %p613_p7 = pnand %p612_p6, %p606_p3 }
  0x11   :  { %616 = shalt.err (!%p613_p7)
}
  0x12   :  { %s714_s15 = smov 64   ;;  %s715_s16 = smov 4  }
  0x13   :  { %41 = dma.hbm_to_vmem [thread:$0]  %s880_s2, 1024, %s36_s28, [#allocation7], %s714_s15, %s714_s15, %s715_s16  }
  0x14   :  { %s716_s19 = smov [#allocation3]   ;;  %s717_s21 = smov [#allocation8]  }
  0x15   :  { %s26_s20 = sshll.u32 %s716_s19, 4  ;;  %s49_s22 = sshll.u32 %s717_s21, 4  ;;  %s27_s20 = int_to_ptr.vmem [resolvable:$true] %s26_s20  ;;  %s50_s22 = int_to_ptr.vmem [resolvable:$true] %s49_s22 }
  0x16   :  { %s617_s25 = scalar_lea.hbm %s879_s1, 128 }
  0x17   :  { %p618_p8 = scmp.ne.s32.totalorder %s879_s1, %s617_s25  ;;  %p621_p9 = scmp.lt.u32.totalorder %s617_s25, %s879_s1 }
  0x19   :  { %p623_p10 = pnand %p621_p9, %p618_p8 }
  0x1b   :  { %626 = shalt.err (!%p623_p10)
}
  0x1c   :  { %s627_s2 = scalar_lea.vmem %s27_s20, 128  ;;  %p632_p12 = scmp.lt.s32.totalorder %s27_s20, %s27_s20 }
  0x1d   :  { %p628_p11 = scmp.ne.s32.totalorder %s27_s20, %s627_s2  ;;  %p633_p13 = scmp.lt.s32.totalorder %s627_s2, %s627_s2 }
  0x1f   :  { %p634_p0 = por %p633_p13, %p632_p12 }
  0x21   :  { %p635_p1 = pnand %p634_p0, %p628_p11 }
  0x23   :  { %638 = shalt.err (!%p635_p1)
}
  0x24   :  { %29 = dma.hbm_to_vmem [thread:$0]  %s879_s1, 128, %s27_s20, [#allocation4]  }
  0x25   :  { %s639_s12 = scalar_lea.hbm %s882_s4, 1024 }
  0x26   :  { %p640_p2 = scmp.ne.s32.totalorder %s882_s4, %s639_s12  ;;  %p643_p3 = scmp.lt.u32.totalorder %s639_s12, %s882_s4 }
  0x28   :  { %p645_p4 = pnand %p643_p3, %p640_p2 }
  0x2a   :  { %648 = shalt.err (!%p645_p4)
}
  0x2b   :  { %s649_s19 = scalar_lea.vmem %s50_s22, 1024  ;;  %p654_p6 = scmp.lt.s32.totalorder %s50_s22, %s50_s22 }
  0x2c   :  { %p650_p5 = scmp.ne.s32.totalorder %s50_s22, %s649_s19  ;;  %p655_p7 = scmp.lt.s32.totalorder %s649_s19, %s649_s19 }
  0x2e   :  { %p656_p8 = por %p655_p7, %p654_p6 }
  0x30   :  { %p657_p9 = pnand %p656_p8, %p650_p5 }
  0x32   :  { %660 = shalt.err (!%p657_p9)
}
  0x33   :  { %55 = dma.hbm_to_vmem [thread:$0]  %s882_s4, 1024, %s50_s22, [#allocation7], %s714_s15, %s714_s15, %s715_s16  }
  0x34   :  { %s718_s21 = smov [#allocation9]   ;;  %s661_s26 = scalar_lea.hbm %s884_s6, 1024 }
  0x35   :  { %s63_s23 = sshll.u32 %s718_s21, 4  ;;  %p662_p10 = scmp.ne.s32.totalorder %s884_s6, %s661_s26  ;;  %s64_s23 = int_to_ptr.vmem [resolvable:$true] %s63_s23 }
  0x36   :  { %p665_p11 = scmp.lt.u32.totalorder %s661_s26, %s884_s6 }
  0x38   :  { %p667_p12 = pnand %p665_p11, %p662_p10 }
  0x3a   :  { %670 = shalt.err (!%p667_p12)
}
  0x3b   :  { %s671_s28 = scalar_lea.vmem %s64_s23, 1024  ;;  %p676_p0 = scmp.lt.s32.totalorder %s64_s23, %s64_s23 }
  0x3c   :  { %p672_p13 = scmp.ne.s32.totalorder %s64_s23, %s671_s28  ;;  %p677_p1 = scmp.lt.s32.totalorder %s671_s28, %s671_s28 }
  0x3e   :  { %p678_p2 = por %p677_p1, %p676_p0 }
  0x40   :  { %p679_p3 = pnand %p678_p2, %p672_p13 }
  0x42   :  { %682 = shalt.err (!%p679_p3)
}
  0x43   :  { %69 = dma.hbm_to_vmem [thread:$0]  %s884_s6, 1024, %s64_s23, [#allocation10], %s714_s15, %s714_s15, %s715_s16  }
  0x44   :  { %705 = dma.done.wait [#allocation4], 128  }
  0x45   :  { %706 = vsyncadd [#allocation4], 4294967168 }
  0x46   :  { %707 = dma.done.wait [#allocation7], 2048  }
  0x47   :  { %708 = vsyncadd [#allocation7], 4294965248 }
  0x48   :  { %709 = dma.done.wait [#allocation10], 1024  }
  0x49   :  { %710 = vsyncadd [#allocation10], 4294966272  ;;  %v719_v0 = vmov 0.0   ;;  %vm720_vm0 = vmmov 0   ;;  %v571_v1 = vld [vmem:[#allocation6] sm:$0xff]   ;;  %v572_v2 = vld [vmem:[#allocation6 + $0x8] sm:$0xff]   ;;  %v200_v27 = vstv %s878_s0 }
  0x4a   :  { %502 = vmatprep.subr.bf16.mxu0 %v719_v0  ;;  %518 = vmatprep.mubr.msk.bf16.mxu0 %vm720_vm0, %v719_v0  ;;  %v573_v3 = vld [vmem:[#allocation6 + $0x10] sm:$0xff]   ;;  %v579_v4 = vld [vmem:[#allocation8] sm:$0xff]   ;;  %v574_v5 = vld [vmem:[#allocation6 + $0x18] sm:$0xff]   ;;  %s721_s12 = smov [#allocation11]  }
  0x4b   :  { %522 = vmatprep.subr.bf16.mxu1 %v719_v0  ;;  %538 = vmatprep.mubr.msk.bf16.mxu1 %vm720_vm0, %v719_v0  ;;  %v580_v6 = vld [vmem:[#allocation8 + $0x8] sm:$0xff]   ;;  %v575_v7 = vld [vmem:[#allocation6 + $0x20] sm:$0xff]   ;;  %v581_v8 = vld [vmem:[#allocation8 + $0x10] sm:$0xff]   ;;  %s437_s13 = sshll.u32 %s721_s12, 4  ;;  %s438_s13 = int_to_ptr.vmem [resolvable:$true] %s437_s13 }
  0x4c   :  { %503 = vmatpush3.bf16.msra.mxu0 %v571_v1  ;;  %523 = vmatpush3.bf16.msra.mxu1 %v579_v4  ;;  %v576_v9 = vld [vmem:[#allocation6 + $0x28] sm:$0xff]   ;;  %v582_v10 = vld [vmem:[#allocation8 + $0x18] sm:$0xff]   ;;  %v577_v11 = vld [vmem:[#allocation6 + $0x30] sm:$0xff]   ;;  %p688_p5 = scmp.lt.s32.totalorder %s438_s13, %s438_s13 }
  0x4d   :  { %504 = vmatprep.subr.bf16.mxu0 %v719_v0  ;;  %524 = vmatprep.subr.bf16.mxu1 %v719_v0  ;;  %v583_v12 = vld [vmem:[#allocation8 + $0x20] sm:$0xff]   ;;  %v578_v13 = vld [vmem:[#allocation6 + $0x38] sm:$0xff]   ;;  %v584_v15 = vld [vmem:[#allocation8 + $0x28] sm:$0xff]  }
  0x4e   :  { %v86_v14 = vld [vmem:[#allocation3] sm:$0xff]  ;;  %v585_v17 = vld [vmem:[#allocation8 + $0x30] sm:$0xff]   ;;  %v587_v19 = vld [vmem:[#allocation9] sm:$0xff]  }
  0x4f   :  { %v87_v16 = vpack.c.bf16 %v86_v14, %v86_v14  ;;  %v586_v18 = vld [vmem:[#allocation8 + $0x38] sm:$0xff]   ;;  %v588_v20 = vld [vmem:[#allocation9 + $0x8] sm:$0xff]   ;;  %v589_v21 = vld [vmem:[#allocation9 + $0x10] sm:$0xff]  }
  0x50   :  { %505 = vmatpush3.bf16.msra.mxu0 %v572_v2  ;;  %525 = vmatpush3.bf16.msra.mxu1 %v580_v6  ;;  %v590_v22 = vld [vmem:[#allocation9 + $0x18] sm:$0xff]   ;;  %v591_v23 = vld [vmem:[#allocation9 + $0x20] sm:$0xff]   ;;  %v592_v24 = vld [vmem:[#allocation9 + $0x28] sm:$0xff]  }
  0x51   :  { %506 = vmatprep.subr.bf16.mxu0 %v719_v0  ;;  %526 = vmatprep.subr.bf16.mxu1 %v719_v0  ;;  %v448_v25 = vld [vmem:[%s881_s3] ss:$0 sm:$0xff]  ;;  %v593_v35 = vld [vmem:[#allocation9 + $0x30] sm:$0xff]  }
  0x52   :  { %v594_v36 = vld [vmem:[#allocation9 + $0x38] sm:$0xff]  }
  0x53   :  { %v457_v37 = vld [vmem:[%s883_s5] ss:$0 sm:$0xff]  ;;  %s683_s5 = scalar_lea.vmem %s438_s13, 128 }
  0x54   :  { %507 = vmatpush3.bf16.msra.mxu0 %v573_v3  ;;  %527 = vmatpush3.bf16.msra.mxu1 %v581_v8  ;;  %v466_v46 = vld [vmem:[%s885_s7] ss:$0 sm:$0xff]  ;;  %p684_p4 = scmp.ne.s32.totalorder %s438_s13, %s683_s5  ;;  %p689_p6 = scmp.lt.s32.totalorder %s683_s5, %s683_s5 }
  0x55   :  { %508 = vmatprep.subr.bf16.mxu0 %v719_v0  ;;  %528 = vmatprep.subr.bf16.mxu1 %v719_v0 }
  0x56   :  { %p690_p7 = por %p689_p6, %p688_p5 }
  0x58   :  { %509 = vmatpush3.bf16.msra.mxu0 %v574_v5  ;;  %529 = vmatpush3.bf16.msra.mxu1 %v582_v10  ;;  %p691_p8 = pnand %p690_p7, %p684_p4 }
  0x59   :  { %510 = vmatprep.subr.bf16.mxu0 %v719_v0  ;;  %530 = vmatprep.subr.bf16.mxu1 %v719_v0 }
  0x5c   :  { %511 = vmatpush3.bf16.msra.mxu0 %v575_v7  ;;  %531 = vmatpush3.bf16.msra.mxu1 %v583_v12 }
  0x5d   :  { %512 = vmatprep.subr.bf16.mxu0 %v719_v0  ;;  %532 = vmatprep.subr.bf16.mxu1 %v719_v0 }
  0x60   :  { %513 = vmatpush3.bf16.msra.mxu0 %v576_v9  ;;  %533 = vmatpush3.bf16.msra.mxu1 %v584_v15 }
  0x61   :  { %514 = vmatprep.subr.bf16.mxu0 %v719_v0  ;;  %534 = vmatprep.subr.bf16.mxu1 %v719_v0 }
  0x64   :  { %515 = vmatpush3.bf16.msra.mxu0 %v577_v11  ;;  %535 = vmatpush3.bf16.msra.mxu1 %v585_v17 }
  0x65   :  { %516 = vmatprep.subr.bf16.mxu0 %v719_v0  ;;  %536 = vmatprep.subr.bf16.mxu1 %v719_v0 }
  0x68   :  { %517 = vmatpush3.bf16.msra.mxu0 %v578_v13  ;;  %537 = vmatpush3.bf16.msra.mxu1 %v586_v18 }
  0x69   :  { %542 = vmatprep.subr.bf16.mxu0 %v719_v0 }
  0x6b   :  { %519 = vmatmul.mubr.bf16.vlgmr.msra.gmra.mrb[0].mxu0 %v87_v16 }
  0x6c   :  { %558 = vmatprep.mubr.msk.bf16.mxu0 %vm720_vm0, %v719_v0  ;;  %543 = vmatpush3.bf16.msra.mxu0 %v587_v19 }
  0x6d   :  { %544 = vmatprep.subr.bf16.mxu0 %v719_v0 }
  0x70   :  { %545 = vmatpush3.bf16.msra.mxu0 %v588_v20 }
  0x71   :  { %546 = vmatprep.subr.bf16.mxu0 %v719_v0 }
  0x74   :  { %547 = vmatpush3.bf16.msra.mxu0 %v589_v21 }
  0x75   :  { %548 = vmatprep.subr.bf16.mxu0 %v719_v0 }
  0x78   :  { %549 = vmatpush3.bf16.msra.mxu0 %v590_v22 }
  0x79   :  { %550 = vmatprep.subr.bf16.mxu0 %v719_v0 }
  0x7c   :  { %551 = vmatpush3.bf16.msra.mxu0 %v591_v23 }
  0x7d   :  { %552 = vmatprep.subr.bf16.mxu0 %v719_v0 }
  0x80   :  { %553 = vmatpush3.bf16.msra.mxu0 %v592_v24 }
  0x81   :  { %554 = vmatprep.subr.bf16.mxu0 %v719_v0 }
  0x84   :  { %555 = vmatpush3.bf16.msra.mxu0 %v593_v35 }
  0x85   :  { %556 = vmatprep.subr.bf16.mxu0 %v719_v0 }
  0x88   :  { %557 = vmatpush3.bf16.msra.mxu0 %v594_v36 }
 0x13e   :  { %v193_v26 = vpop.f32.mrb[0].mxu0 }
 0x13f   :  { %v194_v28 = vadd.f32 %v448_v25, %v193_v26  ;;  %v520_v29 = vpop.f32.mrb[1].mxu0 }
 0x140   :  { %v196_v30 = vpop.f32.mrb[2].mxu0 }
 0x141   :  { %vm199_vm1 = vcmp.gt.f32.partialorder %v194_v28, 0.0  ;;  %v201_v31 = vmul.f32 %v200_v27, %v194_v28  ;;  %v521_v32 = vpop.f32.mrb[3].mxu0 }
 0x143   :  { %v202_v33 = vsel %vm199_vm1, %v194_v28, %v201_v31 }
 0x144   :  { %v203_v34 = vpack.c.bf16 %v202_v33, %v202_v33 }
 0x146   :  { %539 = vmatmul.mubr.bf16.vlgmr.msra.gmra.mrb[0].mxu1 %v203_v34 }
 0x219   :  { %v309_v38 = vpop.f32.mrb[0].mxu1 }
 0x21a   :  { %v310_v39 = vadd.f32 %v457_v37, %v309_v38  ;;  %v540_v40 = vpop.f32.mrb[1].mxu1 }
 0x21b   :  { %v312_v41 = vpop.f32.mrb[2].mxu1 }
 0x21c   :  { %vm315_vm2 = vcmp.gt.f32.partialorder %v310_v39, 0.0  ;;  %v316_v42 = vmul.f32 %v310_v39, %v200_v27  ;;  %v541_v43 = vpop.f32.mrb[3].mxu1 }
 0x21e   :  { %v317_v44 = vsel %vm315_vm2, %v310_v39, %v316_v42 }
 0x21f   :  { %v318_v45 = vpack.c.bf16 %v317_v44, %v317_v44 }
 0x221   :  { %559 = vmatmul.mubr.bf16.vlgmr.msra.gmra.mrb[4].mxu0 %v318_v45 }
 0x2f4   :  { %v424_v47 = vpop.f32.mrb[4].mxu0 }
 0x2f5   :  { %v425_v48 = vadd.f32 %v466_v46, %v424_v47  ;;  %v560_v49 = vpop.f32.mrb[5].mxu0 }
 0x2f6   :  { %v427_v50 = vpop.f32.mrb[6].mxu0 }
 0x2f7   :  { %430 = vst [vmem:[#allocation11] sm:$0xff] %v425_v48  ;;  %v561_v51 = vpop.f32.mrb[7].mxu0 }
 0x2f8   :  { %694 = shalt.err (!%p691_p8)
}
 0x2f9   :  { %s695_s7 = scalar_lea.hbm %s886_s8, 128 }
 0x2fa   :  { %p696_p9 = scmp.ne.s32.totalorder %s886_s8, %s695_s7  ;;  %p699_p10 = scmp.lt.u32.totalorder %s695_s7, %s886_s8 }
 0x2fc   :  { %p701_p11 = pnand %p699_p10, %p696_p9 }
 0x2fe   :  { %704 = shalt.err (!%p701_p11)
}
 0x2ff   :  { %440 = dma.vmem_to_hbm [thread:$0]  %s438_s13, 128, %s886_s8, [#allocation5]  }
 0x300   :  { %711 = dma.done.wait [#allocation5], 128  }
 0x301   :  { %712 = vsyncadd [#allocation5], 4294967168 }
 0x302   :  { %444 = vsyncpa [#allocation4], 1 }
 0x303   :  { %445 = vsyncpa [#allocation7], 1 }
 0x304   :  { %446 = vsyncpa [#allocation10], 1 }
 0x305   :  { %447 = vsyncpa [#allocation5], 1 }

</bundles_post_ra>
